<compile_context>
chip_gen: v5e
topology: v5e:2x2
jax: 0.10.0
libtpu: 0.0.40
codegen_flags: <defaults>
</compile_context>

<pallas_src>
import functools

import jax
import jax.numpy as jnp
import numpy as np
from jax.experimental import pallas as pl
from jax.experimental.pallas import tpu as pltpu


def _round_up(x, m):
    return (x + m - 1) // m * m


def _cdiv(a, b):
    return -(-a // b)


# ----------------------------- Pallas kernel --------------------------------
def _rgcn_axw_kernel(last_k_ref, a_ref, xw_ref, bsum_ref, o_ref, *, apply_relu):
    """One grid step = (dst tile i, relation r, src tile k).

    last_k_ref: (R,) int32 SMEM — scalar-prefetched last valid src-tile index per relation.
    a_ref:   (tile_dst, tile_src)  bf16 normalized adjacency tile of relation r
    xw_ref:  (tile_src, f_out_pad) bf16 pre-projected features of relation r (X @ W, hoisted)
    bsum_ref:(1, f_out_pad)        f32 sum of all per-relation biases for this dst type
    o_ref:   (tile_dst, f_out_pad) f32 output tile; resident accumulator across (r, k)
    """
    r = pl.program_id(1)
    k = pl.program_id(2)
    nr = pl.num_programs(1)
    nk = pl.num_programs(2)

    # First visit of this output tile: zero the resident f32 block.
    @pl.when(jnp.logical_and(r == 0, k == 0))
    def _():
        o_ref[...] = jnp.zeros_like(o_ref)

    # Skip padded src tiles of this relation (the index_map clamps the block index for
    # k > last_k, so the DMA is a no-op repeat and the MXU work is skipped here).
    @pl.when(k <= last_k_ref[r])
    def _():
        o_ref[...] += jnp.dot(a_ref[...], xw_ref[...],
                              preferred_element_type=jnp.float32)

    # Last relation, last src tile: add summed bias (once) and optional relu.
    @pl.when(jnp.logical_and(r == nr - 1, k == nk - 1))
    def _():
        res = o_ref[...] + bsum_ref[...]
        if apply_relu:
            res = jnp.maximum(res, 0.0)
        o_ref[...] = res


def rgcn_dst_pallas(last_k, a_stack, xw_stack, b_sum, *, tile_dst, tile_src,
                    apply_relu, vmem_limit_bytes):
    """All relations sharing one destination node type, summed, in one pallas_call."""
    r_cnt, n_dst_pad, n_src_pad = a_stack.shape
    f_out_pad = xw_stack.shape[-1]
    grid = (n_dst_pad // tile_dst, r_cnt, n_src_pad // tile_src)

    kernel = functools.partial(_rgcn_axw_kernel, apply_relu=apply_relu)
    return pl.pallas_call(
        kernel,
        out_shape=jax.ShapeDtypeStruct((n_dst_pad, f_out_pad), jnp.float32),
        grid_spec=pltpu.PrefetchScalarGridSpec(
            num_scalar_prefetch=1,
            grid=grid,
            in_specs=[
                # A_hat[r] tile (dst tile i, src tile k); clamp k to the last valid src
                # tile of this relation so padded tiles repeat the block index (no re-DMA).
                pl.BlockSpec((pl.Squeezed(), tile_dst, tile_src),
                             lambda i, r, k, lk: (r, i, jnp.minimum(k, lk[r]))),
                # pre-projected features XW[r] tile (src tile k), same clamp
                pl.BlockSpec((pl.Squeezed(), tile_src, f_out_pad),
                             lambda i, r, k, lk: (r, jnp.minimum(k, lk[r]), 0)),
                # summed bias (constant block, DMA'd once)
                pl.BlockSpec((1, f_out_pad), lambda i, r, k, lk: (0, 0)),
            ],
            out_specs=pl.BlockSpec((tile_dst, f_out_pad),
                                   lambda i, r, k, lk: (i, 0)),
        ),
        compiler_params=pltpu.CompilerParams(
            # dst tiles shard across TensorCores (v7x / megacore); relation/src are reductions.
            dimension_semantics=("parallel", "arbitrary", "arbitrary"),
            vmem_limit_bytes=vmem_limit_bytes,
        ),
    )(last_k, a_stack, xw_stack, b_sum)


# ------------------------------ glue (plain JAX) -----------------------------
def normalize_adjacency(a):
    """dgl GraphConv norm='both': A_hat = D_in^{-1/2} A D_out^{-1/2}, degrees clamped >= 1."""
    deg_out = jnp.maximum(a.sum(axis=0), 1.0)  # (n_src,)
    deg_in = jnp.maximum(a.sum(axis=1), 1.0)   # (n_dst,)
    return a * (deg_in[:, None] ** -0.5) * (deg_out[None, :] ** -0.5)


def _tpu_config():
    """Per-generation knobs: VMEM budget and whether the dst axis should get >= 2 tiles."""
    kind = ""
    try:
        kind = jax.devices()[0].device_kind.lower()
    except Exception:
        pass
    is_v7 = "v7" in kind
    multi_tc = is_v7 or ("v4" in kind) or ("v5p" in kind)   # chips with 2 TCs per device
    vmem_limit = (48 if is_v7 else 64) * 1024 * 1024        # v7x has only 64 MiB physical
    return multi_tc, vmem_limit


def _select_tiles(n_dst, max_src, f_out_pad, vmem_budget, min_dst_tiles,
                  max_tile_dst=1024, max_tile_src=2048):
    """Pick (tile_dst, tile_src) from an explicit VMEM footprint formula."""
    tile_dst = min(max_tile_dst, _round_up(n_dst, 8))
    if min_dst_tiles > 1 and n_dst <= tile_dst:
        # ensure the parallel dst axis has >= min_dst_tiles tiles (dual-TC chips)
        tile_dst = min(tile_dst, max(8, _round_up(_cdiv(n_dst, min_dst_tiles), 8)))
    tile_src = min(max_tile_src, _round_up(max_src, 128))

    def footprint(td, ts):
        return (2 * td * ts * 2            # A tile, double-buffered, bf16
                + 2 * ts * f_out_pad * 2   # XW tile, double-buffered, bf16
                + 2 * td * f_out_pad * 4   # resident f32 output block (double-buffered)
                + 2 * f_out_pad * 4)       # bias

    while footprint(tile_dst, tile_src) > vmem_budget and tile_src > 128:
        tile_src = max(128, (tile_src // 2) // 128 * 128)
    while footprint(tile_dst, tile_src) > vmem_budget and tile_dst > 8:
        tile_dst = max(8, (tile_dst // 2) // 8 * 8)
    return tile_dst, tile_src


def hetero_conv_layer(adj_norm, feats, layer_params, node_counts, *, apply_relu):
    """HeteroGraphConv({rel: GraphConv}, aggregate='sum'): one Pallas kernel per dst type."""
    multi_tc, vmem_limit = _tpu_config()
    vmem_budget = int(vmem_limit * 0.75)   # headroom for compiler scratch / semaphores

    by_dst = {}
    for (st, rel, dt) in layer_params:
        if st not in feats:
            continue  # matches DGL: relations whose src type has no features are skipped
        by_dst.setdefault(dt, []).append((st, rel, dt))

    out = {}
    for dt, cets in sorted(by_dst.items()):
        n_dst = node_counts[dt]
        f_out = layer_params[cets[0]]["w"].shape[-1]
        f_out_pad = _round_up(f_out, 128)
        max_src = max(feats[st].shape[0] for (st, _r, _d) in cets)

        tile_dst, tile_src = _select_tiles(
            n_dst, max_src, f_out_pad, vmem_budget,
            min_dst_tiles=2 if multi_tc else 1)
        n_dst_pad = _round_up(n_dst, tile_dst)
        n_src_pad = _round_up(max_src, tile_src)

        a_list, xw_list, last_k = [], [], []
        b_sum = jnp.zeros((f_out,), jnp.float32)
        for cet in cets:
            st = cet[0]
            a = adj_norm[cet]  # (n_dst, n_src_of_type)
            a_list.append(jnp.pad(a, ((0, n_dst_pad - a.shape[0]),
                                      (0, n_src_pad - a.shape[1]))).astype(jnp.bfloat16))
            # Hoisted per-relation projection X @ W (done once, not per dst tile).
            xw = jnp.dot(feats[st].astype(jnp.float32),
                         layer_params[cet]["w"].astype(jnp.float32))  # (n_src, f_out)
            xw_list.append(jnp.pad(xw, ((0, n_src_pad - xw.shape[0]),
                                        (0, f_out_pad - f_out))).astype(jnp.bfloat16))
            b_sum = b_sum + layer_params[cet]["b"]
            last_k.append(_cdiv(feats[st].shape[0], tile_src) - 1)

        a_stack = jnp.stack(a_list)                                   # (R, n_dst_pad, n_src_pad)
        xw_stack = jnp.stack(xw_list)                                 # (R, n_src_pad, f_out_pad)
        b_sum_pad = jnp.pad(b_sum, (0, f_out_pad - f_out))[None, :]   # (1, f_out_pad)
        last_k_arr = jnp.asarray(last_k, jnp.int32)                   # (R,)

        y = rgcn_dst_pallas(last_k_arr, a_stack, xw_stack, b_sum_pad,
                            tile_dst=tile_dst, tile_src=tile_src,
                            apply_relu=apply_relu,
                            vmem_limit_bytes=vmem_limit)
        out[dt] = y[:n_dst, :f_out]
    return out


def rgcn_forward(adjacencies, inputs, params1, params2, node_counts):
    adj_norm = {k: normalize_adjacency(v) for k, v in adjacencies.items()}
    h = hetero_conv_layer(adj_norm, inputs, params1, node_counts, apply_relu=True)
    h = hetero_conv_layer(adj_norm, h, params2, node_counts, apply_relu=False)
    return h


# ------------------------------ reference (pure JAX) --------------------------
def _ref_layer(adj_norm, feats, layer_params, apply_relu):
    out = {}
    for (st, rel, dt), p in layer_params.items():
        contrib = adj_norm[(st, rel, dt)] @ (feats[st] @ p["w"]) + p["b"]
        out[dt] = out.get(dt, 0.0) + contrib
    if apply_relu:
        out = {k: jnp.maximum(v, 0.0) for k, v in out.items()}
    return out


def rgcn_reference(adjacencies, inputs, params1, params2):
    adj_norm = {k: normalize_adjacency(v) for k, v in adjacencies.items()}
    h = _ref_layer(adj_norm, inputs, params1, apply_relu=True)
    return _ref_layer(adj_norm, h, params2, apply_relu=False)


# ----------------------------------- main ------------------------------------
if __name__ == "__main__":
    key = jax.random.PRNGKey(0)

    in_feats, hid_feats, out_feats = 16, 32, 8
    node_counts = {"user": 12, "item": 10}
    # canonical etypes (src_type, relation, dst_type)
    rel_names = [
        ("user", "follow", "user"),
        ("user", "click", "item"),
        ("item", "clicked-by", "user"),
    ]

    keys = jax.random.split(key, 4 + 4 * len(rel_names))
    k_iter = iter(keys)

    # node input features
    inputs = {
        "user": jax.random.normal(next(k_iter), (node_counts["user"], in_feats), jnp.float32),
        "item": jax.random.normal(next(k_iter), (node_counts["item"], in_feats), jnp.float32),
    }

    # synthetic 0/1 adjacencies (n_dst, n_src)
    adjacencies = {}
    for (st, rel, dt) in rel_names:
        a = jax.random.bernoulli(
            next(k_iter), 0.3, (node_counts[dt], node_counts[st])
        ).astype(jnp.float32)
        adjacencies[(st, rel, dt)] = a

    # deterministic per-relation GraphConv parameters for both layers
    params1, params2 = {}, {}
    for (st, rel, dt) in rel_names:
        params1[(st, rel, dt)] = {
            "w": 0.1 * jax.random.normal(next(k_iter), (in_feats, hid_feats), jnp.float32),
            "b": jnp.zeros((hid_feats,), jnp.float32),
        }
        params2[(st, rel, dt)] = {
            "w": 0.1 * jax.random.normal(next(k_iter), (hid_feats, out_feats), jnp.float32),
            "b": jnp.zeros((out_feats,), jnp.float32),
        }

    out = rgcn_forward(adjacencies, inputs, params1, params2, node_counts)
    out = jax.tree_util.tree_map(jax.block_until_ready, out)

    ref = rgcn_reference(adjacencies, inputs, params1, params2)
    for nt in out:
        assert out[nt].shape == (node_counts[nt], out_feats), out[nt].shape
        np.testing.assert_allclose(
            np.asarray(out[nt]), np.asarray(ref[nt]), rtol=2e-2, atol=2e-2
        )

    print("KERNEL_OK")
</pallas_src>

<mosaic_0001>
module attributes {stable_mosaic.version = 11 : i64} {
  func.func @_rgcn_axw_kernel(%arg0: i32, %arg1: i32, %arg2: i32, %arg3: memref<1xi32, #tpu.memory_space<smem>>, %arg4: memref<1x16x128xbf16, #tpu.memory_space<vmem>>, %arg5: memref<1x128x128xbf16, #tpu.memory_space<vmem>>, %arg6: memref<1x128xf32, #tpu.memory_space<vmem>>, %arg7: memref<16x128xf32, #tpu.memory_space<vmem>>) attributes {dimension_semantics = [#tpu.dimension_semantics<parallel>, #tpu.dimension_semantics<arbitrary>, #tpu.dimension_semantics<arbitrary>], iteration_bounds = array<i64: 1, 1, 1>, scalar_prefetch = 1 : i64, scratch_operands = 0 : i64, tpu.core_type = #tpu.core_type<tc>, window_params = [{transform_indices = @transform_0, window_bounds = array<i64: 1, 16, 128>}, {transform_indices = @transform_1, window_bounds = array<i64: 1, 128, 128>}, {pipeline_mode = #tpu.pipeline_mode<synchronous>, transform_indices = @transform_2, window_bounds = array<i64: 1, 128>}, {transform_indices = @transform_3, window_bounds = array<i64: 16, 128>}]} {
    %c0_i32 = arith.constant 0 : i32
    %0 = arith.cmpi eq, %arg1, %c0_i32 : i32
    %c0_i32_0 = arith.constant 0 : i32
    %1 = arith.cmpi eq, %arg2, %c0_i32_0 : i32
    %2 = arith.andi %0, %1 : i1
    %3 = arith.extui %2 : i1 to i32
    %c0_i32_1 = arith.constant 0 : i32
    %4 = arith.cmpi ne, %3, %c0_i32_1 : i32
    scf.if %4 {
      %cst = arith.constant 0.000000e+00 : f32
      %15 = vector.broadcast %cst : f32 to vector<16x128xf32>
      %c0 = arith.constant 0 : index
      %c0_6 = arith.constant 0 : index
      %16 = vector.load %arg7[%c0, %c0_6] : memref<16x128xf32, #tpu.memory_space<vmem>>, vector<16x128xf32>
      tpu.vector_store %arg7[%c0, %c0_6], %15 {strides = array<i32>} : memref<16x128xf32, #tpu.memory_space<vmem>>, vector<16x128xf32>,
    } else {
    }
    %5 = arith.index_cast %arg1 : i32 to index
    %6 = memref.load %arg3[%5] : memref<1xi32, #tpu.memory_space<smem>>
    %7 = arith.cmpi sle, %arg2, %6 : i32
    %8 = arith.extui %7 : i1 to i32
    %c0_i32_2 = arith.constant 0 : i32
    %9 = arith.cmpi ne, %8, %c0_i32_2 : i32
    scf.if %9 {
      %c0 = arith.constant 0 : index
      %c0_6 = arith.constant 0 : index
      %15 = vector.load %arg7[%c0, %c0_6] : memref<16x128xf32, #tpu.memory_space<vmem>>, vector<16x128xf32>
      %c0_7 = arith.constant 0 : index
      %c0_8 = arith.constant 0 : index
      %c0_9 = arith.constant 0 : index
      %16 = vector.load %arg4[%c0_7, %c0_8, %c0_9] : memref<1x16x128xbf16, #tpu.memory_space<vmem>>, vector<1x16x128xbf16>
      %17 = vector.shape_cast %16 : vector<1x16x128xbf16> to vector<16x128xbf16>
      %c0_10 = arith.constant 0 : index
      %c0_11 = arith.constant 0 : index
      %c0_12 = arith.constant 0 : index
      %18 = vector.load %arg5[%c0_10, %c0_11, %c0_12] : memref<1x128x128xbf16, #tpu.memory_space<vmem>>, vector<1x128x128xbf16>
      %19 = vector.shape_cast %18 : vector<1x128x128xbf16> to vector<128x128xbf16>
      %cst = arith.constant dense<0.000000e+00> : vector<16x128xf32>
      %20 = tpu.matmul %17, %19, %cst {dimension_numbers = #tpu.dot_dimension_numbers<[1], [0], [0], [1], [0, 0, 1, 1], [], []>} : vector<16x128xbf16>, vector<128x128xbf16>, vector<16x128xf32> -> vector<16x128xf32>
      %21 = arith.addf %15, %20 : vector<16x128xf32>
      %c0_13 = arith.constant 0 : index
      %c0_14 = arith.constant 0 : index
      %22 = vector.load %arg7[%c0_13, %c0_14] : memref<16x128xf32, #tpu.memory_space<vmem>>, vector<16x128xf32>
      tpu.vector_store %arg7[%c0_13, %c0_14], %21 {strides = array<i32>} : memref<16x128xf32, #tpu.memory_space<vmem>>, vector<16x128xf32>,
    } else {
    }
    %c0_i32_3 = arith.constant 0 : i32
    %10 = arith.cmpi eq, %arg1, %c0_i32_3 : i32
    %c0_i32_4 = arith.constant 0 : i32
    %11 = arith.cmpi eq, %arg2, %c0_i32_4 : i32
    %12 = arith.andi %10, %11 : i1
    %13 = arith.extui %12 : i1 to i32
    %c0_i32_5 = arith.constant 0 : i32
    %14 = arith.cmpi ne, %13, %c0_i32_5 : i32
    scf.if %14 {
      %c0 = arith.constant 0 : index
      %c0_6 = arith.constant 0 : index
      %15 = vector.load %arg7[%c0, %c0_6] : memref<16x128xf32, #tpu.memory_space<vmem>>, vector<16x128xf32>
      %c0_7 = arith.constant 0 : index
      %c0_8 = arith.constant 0 : index
      %16 = vector.load %arg6[%c0_7, %c0_8] : memref<1x128xf32, #tpu.memory_space<vmem>>, vector<1x128xf32>
      %17 = vector.broadcast %16 : vector<1x128xf32> to vector<16x128xf32>
      %18 = arith.addf %15, %17 : vector<16x128xf32>
      %cst = arith.constant 0.000000e+00 : f32
      %19 = vector.broadcast %cst : f32 to vector<16x128xf32>
      %20 = arith.maximumf %18, %19 : vector<16x128xf32>
      %c0_9 = arith.constant 0 : index
      %c0_10 = arith.constant 0 : index
      %21 = vector.load %arg7[%c0_9, %c0_10] : memref<16x128xf32, #tpu.memory_space<vmem>>, vector<16x128xf32>
      tpu.vector_store %arg7[%c0_9, %c0_10], %20 {strides = array<i32>} : memref<16x128xf32, #tpu.memory_space<vmem>>, vector<16x128xf32>,
    } else {
    }
    return
  }
  func.func @transform_0(%arg0: i32, %arg1: i32, %arg2: i32, %arg3: memref<1xi32, #tpu.memory_space<smem>>) -> (i32, i32, i32) {
    %0 = arith.index_cast %arg1 : i32 to index
    %1 = memref.load %arg3[%0] : memref<1xi32, #tpu.memory_space<smem>>
    %2 = arith.minsi %arg2, %1 : i32
    %c0_i32 = arith.constant 0 : i32
    return %arg1, %arg0, %2 : i32, i32, i32
  }
  func.func @transform_1(%arg0: i32, %arg1: i32, %arg2: i32, %arg3: memref<1xi32, #tpu.memory_space<smem>>) -> (i32, i32, i32) {
    %0 = arith.index_cast %arg1 : i32 to index
    %1 = memref.load %arg3[%0] : memref<1xi32, #tpu.memory_space<smem>>
    %2 = arith.minsi %arg2, %1 : i32
    %c0_i32 = arith.constant 0 : i32
    %c0_i32_0 = arith.constant 0 : i32
    return %arg1, %2, %c0_i32 : i32, i32, i32
  }
  func.func @transform_2(%arg0: i32, %arg1: i32, %arg2: i32, %arg3: memref<1xi32, #tpu.memory_space<smem>>) -> (i32, i32) {
    %c0_i32 = arith.constant 0 : i32
    %c0_i32_0 = arith.constant 0 : i32
    %c0_i32_1 = arith.constant 0 : i32
    return %c0_i32, %c0_i32_0 : i32, i32
  }
  func.func @transform_3(%arg0: i32, %arg1: i32, %arg2: i32, %arg3: memref<1xi32, #tpu.memory_space<smem>>) -> (i32, i32) {
    %c0_i32 = arith.constant 0 : i32
    %c0_i32_0 = arith.constant 0 : i32
    return %arg0, %c0_i32 : i32, i32
  }
}

</mosaic_0001>

<bundles_post_ra>
// kernel: tpu_custom_call.1
= control target key start
LH: loop header
LB: loop body
LE: loop exit
PB: predicated region body
PF: predicated region fallthrough
CT: control target
= control target key end

     0   :  { %10 = vsyncpa [#allocation5], 0  ;;  %s416_s0 = inlined_call_operand.<no memory space> [shape: s32[1], index: 0, kind: input, shape index: {}]   ;;  %s417_s1 = inlined_call_operand.hbm [shape: bf16[1,16,128], index: 1, kind: input, shape index: {}]   ;;  %s418_s2 = inlined_call_operand.hbm [shape: bf16[1,128,128], index: 2, kind: input, shape index: {}]   ;;  %s419_s3 = inlined_call_operand.vmem [shape: f32[1,128], index: 3, kind: input, shape index: {}]   ;;  %s420_s4 = inlined_call_operand.hbm [shape: f32[16,128], index: 4, kind: output, shape index: {}]  }
   0x1   :  { %11 = vsyncpa [#allocation8], 0 }
   0x2   :  { %12 = vsyncpa [#allocation6], 0  ;;  %p210_p0 = scmp.gt.s32.totalorder %s416_s0, 0  ;;  %s350_s17 = smov [#allocation4]  }
   0x3   :  { %s24_s18 = sshll.u32 %s350_s17, 4  ;;  %s276_s10 = scalar_lea.hbm %s417_s1, 8  ;;  %s25_s18 = int_to_ptr.vmem [resolvable:$true] %s24_s18 }
   0x4   :  { %s17_s21 = scalar_select %p210_p0, 0, %s416_s0 }
   0x6   :  { %s211_s22 = sshll.u32 %s17_s21, 2  ;;  %s253_s23 = sshll.u32 %s17_s21, 6 }
   0x7   :  { %s21_s26 = scalar_lea.hbm %s417_s1, %s211_s22  ;;  %s40_s29 = scalar_lea.hbm %s418_s2, %s253_s23 }
   0x8   :  { %s22_s30 = sshll.u32 %s21_s26, 4  ;;  %s41_s5 = sshll.u32 %s40_s29, 4  ;;  %s23_s30 = int_to_ptr.hbm [resolvable:$true] %s22_s30  ;;  %s42_s5 = int_to_ptr.hbm [resolvable:$true] %s41_s5 }
   0x9   :  { %s272_s6 = sshra.s32 %s23_s30, 4  ;;  %s273_s6 = int_to_ptr.hbm [resolvable:$true] %s272_s6 }
   0xa   :  { %s274_s7 = scalar_lea.hbm %s273_s6, 8  ;;  %p277_p2 = scmp.lt.s32.totalorder %s273_s6, %s417_s1 }
   0xb   :  { %p275_p1 = scmp.ne.s32.totalorder %s273_s6, %s274_s7  ;;  %p278_p3 = scmp.lt.s32.totalorder %s276_s10, %s274_s7 }
   0xd   :  { %p279_p4 = por %p278_p3, %p277_p2 }
   0xf   :  { %p280_p5 = pnand %p279_p4, %p275_p1 }
  0x11   :  { %283 = shalt.err (!%p280_p5)
}
  0x12   :  { %s351_s13 = smov 64   ;;  %s352_s14 = smov 4  }
  0x13   :  { %30 = dma.hbm_to_vmem [thread:$0]  %s23_s30, 128, %s25_s18, [#allocation5], %s351_s13, %s351_s13, %s352_s14  }
  0x14   :  { %s353_s15 = smov [#allocation7]   ;;  %s296_s17 = sshra.s32 %s42_s5, 4  ;;  %s297_s17 = int_to_ptr.hbm [resolvable:$true] %s296_s17 }
  0x15   :  { %s43_s16 = sshll.u32 %s353_s15, 4  ;;  %s298_s19 = scalar_lea.hbm %s297_s17, 64  ;;  %s44_s16 = int_to_ptr.vmem [resolvable:$true] %s43_s16 }
  0x16   :  { %p299_p6 = scmp.ne.s32.totalorder %s297_s17, %s298_s19  ;;  %s300_s22 = scalar_lea.hbm %s418_s2, 64 }
  0x17   :  { %p301_p7 = scmp.lt.s32.totalorder %s297_s17, %s418_s2  ;;  %p302_p8 = scmp.lt.s32.totalorder %s300_s22, %s298_s19 }
  0x19   :  { %p303_p9 = por %p302_p8, %p301_p7 }
  0x1b   :  { %p304_p10 = pnand %p303_p9, %p299_p6 }
  0x1d   :  { %307 = shalt.err (!%p304_p10)
}
  0x1e   :  { %49 = dma.hbm_to_vmem [thread:$0]  %s42_s5, 1024, %s44_s16, [#allocation8], %s351_s13, %s351_s13, %s352_s14  }
  0x1f   :  { %344 = dma.done.wait [#allocation5], 128  }
  0x20   :  { %345 = vsyncadd [#allocation5], 4294967168 }
  0x21   :  { %346 = dma.done.wait [#allocation8], 1024  }
  0x22   :  { %347 = vsyncadd [#allocation8], 4294966272  ;;  %v354_v0 = vmov 0.0   ;;  %p216_p11 = scmp.lt.s32.totalorder %s416_s0, 0 }
  0x23   :  { %73 = vst [vmem:[#allocation9] sm:$0xff] %v354_v0 }
  0x24   :  { %74 = vst [vmem:[#allocation9 + $0x8] sm:$0xff] %v354_v0  ;;  %79 = sbr.rel (%p216_p11) target bundleno = 210 (0xd2), region = 29 }
  0x29   :  { %v262_v1 = vld [vmem:[#allocation7 + $0x38] sm:$0xff]  ;;  %v261_v2 = vld [vmem:[#allocation7 + $0x30] sm:$0xff]  ;;  %v260_v3 = vld [vmem:[#allocation7 + $0x28] sm:$0xff] }
  0x2a   :  { %154 = vmatpush.bf16.msra.mxu0 %v262_v1  ;;  %v259_v4 = vld [vmem:[#allocation7 + $0x20] sm:$0xff]  ;;  %v258_v5 = vld [vmem:[#allocation7 + $0x18] sm:$0xff]  ;;  %v257_v6 = vld [vmem:[#allocation7 + $0x10] sm:$0xff] }
  0x2b   :  { %v256_v7 = vld [vmem:[#allocation7 + $0x8] sm:$0xff]  ;;  %v255_v8 = vld [vmem:[#allocation7] sm:$0xff]  ;;  %v254_v9 = vld [vmem:[#allocation4] sm:$0xff] }
  0x2c   :  { %v80_v10 = vld [vmem:[#allocation9] sm:$0xff]  ;;  %v81_v13 = vld [vmem:[#allocation9 + $0x8] sm:$0xff] }
  0x2e   :  { %155 = vmatpush.bf16.msra.mxu0 %v261_v2 }
  0x32   :  { %156 = vmatpush.bf16.msra.mxu0 %v260_v3 }
  0x36   :  { %157 = vmatpush.bf16.msra.mxu0 %v259_v4 }
  0x3a   :  { %158 = vmatpush.bf16.msra.mxu0 %v258_v5 }
  0x3e   :  { %159 = vmatpush.bf16.msra.mxu0 %v257_v6 }
  0x42   :  { %160 = vmatpush.bf16.msra.mxu0 %v256_v7 }
  0x46   :  { %161 = vmatpush.bf16.msra.mxu0 %v255_v8 }
  0x49   :  { %162 = vmatmul.bf16.vlgmr.msra.gmra.mxu0 %v254_v9 }
  0xc6   :  { %v163_v11 = vpop.f32.mrf.mxu0 }
  0xc7   :  { %v168_v12 = vadd.f32 %v163_v11, %v80_v10 }
  0xc9   :  { %170 = vst [vmem:[#allocation9] sm:$0xff] %v168_v12 }
  0xce   :  { %v165_v14 = vpop.f32.mrf.mxu0 }
  0xcf   :  { %v169_v15 = vadd.f32 %v165_v14, %v81_v13 }
  0xd1   :  { %171 = vst [vmem:[#allocation9 + $0x8] sm:$0xff] %v169_v15 }
  0xd2 PF:  { %v271_v17 = vld [vmem:[%s419_s3] ss:$0 sm:$0xff]  ;;  %s355_s25 = smov [#allocation9]   ;;  %s192_s29 = sshll.u32 %s420_s4, 4  ;;  %s193_s29 = int_to_ptr.hbm [resolvable:$true] %s192_s29 }
  0xd3   :  { %v174_v16 = vld [vmem:[#allocation9] sm:$0xff]  ;;  %s190_s26 = sshll.u32 %s355_s25, 4  ;;  %s356_s30 = smov 128   ;;  %s191_s26 = int_to_ptr.vmem [resolvable:$true] %s190_s26 }
  0xd4   :  { %v180_v19 = vadd.f32 %v271_v17, %v174_v16  ;;  %s357_s5 = smov 8  }
  0xd6   :  { %v182_v21 = vmax.f32 %v180_v19, 0.0 }
  0xd8   :  { %v175_v18 = vld [vmem:[#allocation9 + $0x8] sm:$0xff]  ;;  %184 = vst [vmem:[#allocation9] sm:$0xff] %v182_v21 }
  0xd9   :  { %v181_v20 = vadd.f32 %v271_v17, %v175_v18 }
  0xdb   :  { %v183_v22 = vmax.f32 %v181_v20, 0.0 }
  0xdd   :  { %185 = vst [vmem:[#allocation9 + $0x8] sm:$0xff] %v183_v22 }
  0xde   :  { %198 = dma.vmem_to_hbm [thread:$0]  %s191_s26, 256, %s193_s29, [#allocation6], %s356_s30, %s356_s30, %s357_s5  }
  0xdf   :  { %348 = dma.done.wait [#allocation6], 256  }
  0xe0   :  { %349 = vsyncadd [#allocation6], 4294967040 }
  0xe1   :  { %203 = vsyncpa [#allocation5], 1 }
  0xe2   :  { %204 = vsyncpa [#allocation8], 1 }
  0xe3   :  { %205 = vsyncpa [#allocation6], 1 }

</bundles_post_ra>
